<compile_context>
chip_gen: v7x
topology: tpu7x:2x2x1
jax: 0.10.0
libtpu: 0.0.40
codegen_flags: <defaults>
</compile_context>

<pallas_src>
import numpy as np
import jax
import jax.numpy as jnp
from jax.experimental import pallas as pl
from jax.experimental.pallas import tpu as pltpu

# ---- small, fixed config (mirrors config['model'] / config['diffusion']) ----
B, K, L = 2, 8, 16            # batch, n_feature, d_time
NUM_STEPS = 50                # config['diffusion']['num_steps']
BETA_START, BETA_END = 1e-4, 0.5
LOSS_WEIGHT_P = 1.0           # config['model']['loss_weight_p']
LOSS_WEIGHT_F = 1.0           # config['model']['loss_weight_f']
TARGET_STRATEGY = "random"    # config['model']['target_strategy']


# --------------------------- fused Pallas kernel -----------------------------

def _fused_sadi_loss_kernel(sa_ref, soma_ref,              # SMEM (B,)   scalars
                            x_ref, cm_ref, om_ref, nz_ref,  # VMEM (B,K,L)
                            w_ref, b_ref, emb_ref,          # VMEM params
                            loss_ref):                      # SMEM (1,1)
    """Entire SADI training-loss path, VMEM resident, one scalar output.

    Per batch element b (statically unrolled, B is tiny):
      noisy      = sqrt(a_t)*x + sqrt(1-a_t)*noise
      cond_obs   = cond_mask * x
      noisy_tgt  = (1-cond_mask) * noisy
      diffmodel  = [cond_obs | noisy_tgt | cond_mask | 1-cond_mask] @ W + b + emb[t]
                   (implemented as 4 row-block matmuls -> no operand concat)
      loss terms = masked squared residuals of predicted_{1,2,3} vs noise
    """
    # Hoisted parameter loads: split W into its four L-row blocks, cast ONCE at
    # the MXU boundary (elementwise math stays f32 for v5e's f32-only VPU).
    w = w_ref[...]                                          # (4L, 3L) f32
    w_cond = w[0 * L:1 * L, :].astype(jnp.bfloat16)
    w_tgt = w[1 * L:2 * L, :].astype(jnp.bfloat16)
    w_cm = w[2 * L:3 * L, :].astype(jnp.bfloat16)
    w_icm = w[3 * L:4 * L, :].astype(jnp.bfloat16)
    bias = b_ref[...]                                       # (1, 3L)
    emb = emb_ref[...]                                      # (B, 3L)

    s1 = jnp.float32(0.0)
    s2 = jnp.float32(0.0)
    s3 = jnp.float32(0.0)
    n_eval = jnp.float32(0.0)

    for i in range(B):                                      # static unroll
        xi = x_ref[i]                                       # (K, L)
        cmi = cm_ref[i]
        omi = om_ref[i]
        nzi = nz_ref[i]
        sa = sa_ref[i]                                      # SMEM scalar
        soma = soma_ref[i]

        one_m_cm = 1.0 - cmi                                # hoisted, reused twice
        noisy = sa * xi + soma * nzi
        cond_obs = cmi * xi
        noisy_tgt = one_m_cm * noisy

        # surrogate diffmodel: (K, 4L) @ (4L, 3L) decomposed by weight row-block
        out = (
            jnp.dot(cond_obs.astype(jnp.bfloat16), w_cond,
                    preferred_element_type=jnp.float32)
            + jnp.dot(noisy_tgt.astype(jnp.bfloat16), w_tgt,
                      preferred_element_type=jnp.float32)
            + jnp.dot(cmi.astype(jnp.bfloat16), w_cm,
                      preferred_element_type=jnp.float32)
            + jnp.dot(one_m_cm.astype(jnp.bfloat16), w_icm,
                      preferred_element_type=jnp.float32)
            + bias
            + emb[i:i + 1, :]                               # per-batch broadcast
        )                                                   # (K, 3L) f32

        p1 = out[:, 0 * L:1 * L]
        p2 = out[:, 1 * L:2 * L]
        p3 = out[:, 2 * L:3 * L]

        tm = omi - cmi                                      # target_mask
        r1 = (nzi - p1) * tm
        r2 = (nzi - p2) * tm
        r3 = (nzi - p3) * tm
        s1 = s1 + jnp.sum(r1 * r1)
        s2 = s2 + jnp.sum(r2 * r2)
        s3 = s3 + jnp.sum(r3 * r3)
        n_eval = n_eval + jnp.sum(tm)

    denom = jnp.where(n_eval > 0, n_eval, 1.0)
    pred_loss = 0.5 * (s1 + s2)
    loss_ref[0, 0] = (LOSS_WEIGHT_F * s3 + LOSS_WEIGHT_P * pred_loss) / (2.0 * denom)


# --------------------------- Pallas wrapper ----------------------------------

_VMEM = pl.BlockSpec(memory_space=pltpu.MemorySpace.VMEM)
_SMEM = pl.BlockSpec(memory_space=pltpu.MemorySpace.SMEM)


def sadi_fused_loss(observed_data, cond_mask, observed_mask, noise,
                    sqrt_alpha, sqrt_1m_alpha, w, b, emb_t):
    """One pallas_call: inputs -> scalar loss. No intermediate HBM traffic."""
    loss = pl.pallas_call(
        _fused_sadi_loss_kernel,
        out_shape=jax.ShapeDtypeStruct((1, 1), jnp.float32),
        in_specs=[_SMEM, _SMEM,            # sqrt_alpha, sqrt_1m_alpha
                  _VMEM, _VMEM, _VMEM, _VMEM,   # data, cond_mask, obs_mask, noise
                  _VMEM, _VMEM, _VMEM],         # w, b, emb_t
        out_specs=_SMEM,
    )(sqrt_alpha, sqrt_1m_alpha,
      observed_data, cond_mask, observed_mask, noise,
      w, b, emb_t)
    return loss[0, 0]


# --------------------------- SADI_base analogue ------------------------------

def get_randmask_np(observed_mask, rng):
    """Host-side port of SADI_base.get_randmask (data-dependent topk masking)."""
    # TODO(synk): host-side numpy (not jit-traceable); the per-sample topk with a
    # data-dependent count has no clean single-kernel Pallas equivalent.
    Bn = observed_mask.shape[0]
    rand_for_mask = rng.random(observed_mask.shape).astype(np.float64) * observed_mask
    rand_flat = rand_for_mask.reshape(Bn, -1)
    for i in range(Bn):
        sample_ratio = rng.random()
        num_observed = observed_mask[i].sum()
        num_masked = int(round(float(num_observed) * sample_ratio))
        if num_masked > 0:
            idx = np.argsort(rand_flat[i])[::-1][:num_masked]
            rand_flat[i][idx] = -1
    return (rand_flat > 0).reshape(observed_mask.shape).astype(np.float32)


class SADIBaseJAX:
    def __init__(self, key):
        # 'quad' schedule
        self.beta = np.linspace(BETA_START ** 0.5, BETA_END ** 0.5, NUM_STEPS) ** 2
        self.alpha_hat = 1.0 - self.beta
        self.alpha = np.cumprod(self.alpha_hat)
        # precomputed per-step scalars (gathered per batch, passed via SMEM)
        self.sqrt_alpha = jnp.asarray(np.sqrt(self.alpha), jnp.float32)
        self.sqrt_1m_alpha = jnp.asarray(np.sqrt(1.0 - self.alpha), jnp.float32)
        # deterministic surrogate-diffmodel parameters
        # TODO(synk): the real SADI diffmodel (multi-layer joint time/feature
        # transformer encoders) is defined outside SADI_base; a single linear
        # projection + diffusion-step embedding stands in for it here
        # (produces predicted_1/2/3).
        k1, k2 = jax.random.split(key, 2)
        self.params = {
            "w": jax.random.normal(k1, (4 * L, 3 * L), jnp.float32) * 0.02,
            "b": jnp.zeros((1, 3 * L), jnp.float32),
            "diff_emb": jax.random.normal(k2, (NUM_STEPS, 3 * L), jnp.float32) * 0.02,
        }

    def process_data(self, batch):
        return (batch["observed_data"], batch["observed_mask"], batch["gt_mask"],
                batch["for_pattern_mask"], batch["cut_length"], None, None)

    def calc_loss(self, observed_data, cond_mask, observed_mask, t, noise):
        sa = self.sqrt_alpha[t]            # (B,) scalars -> SMEM
        soma = self.sqrt_1m_alpha[t]       # (B,)
        emb_t = self.params["diff_emb"][t]  # (B, 3L) gathered rows (no repeat)
        return sadi_fused_loss(observed_data, cond_mask, observed_mask, noise,
                               sa, soma, self.params["w"], self.params["b"], emb_t)

    def forward(self, batch, key, is_train=1):
        observed_data, observed_mask, gt_mask, for_pattern_mask, _, _, _ = \
            self.process_data(batch)
        if is_train == 0:
            cond_mask = gt_mask
        else:
            # target_strategy == 'random' -> get_randmask; seed derived from the
            # forward key so cond_mask differs across forward passes.
            k_seed, key = jax.random.split(key)
            seed = int(jax.random.randint(k_seed, (), 0, jnp.iinfo(jnp.int32).max))
            cond_mask = jnp.asarray(
                get_randmask_np(np.asarray(observed_mask), np.random.default_rng(seed)))
        kt, kn = jax.random.split(key)
        t = jax.random.randint(kt, (B,), 0, NUM_STEPS)       # is_train == 1 path
        noise = jax.random.normal(kn, observed_data.shape, jnp.float32)
        return self.calc_loss(observed_data, cond_mask, observed_mask, t, noise)


# ------------------------------- main ----------------------------------------

if __name__ == "__main__":
    key = jax.random.PRNGKey(0)
    k_model, k_data, k_mask, k_fwd = jax.random.split(key, 4)

    observed_data = jax.random.normal(k_data, (B, K, L), jnp.float32)
    observed_mask = (jax.random.uniform(k_mask, (B, K, L)) < 0.9).astype(jnp.float32)
    gt_mask = (jax.random.uniform(jax.random.fold_in(k_mask, 1), (B, K, L)) < 0.8
               ).astype(jnp.float32) * observed_mask
    batch = {
        "observed_data": observed_data,
        "observed_mask": observed_mask,
        "gt_mask": gt_mask,
        "for_pattern_mask": observed_mask,
        "cut_length": jnp.zeros((B,), jnp.int32),
    }

    model = SADIBaseJAX(k_model)
    loss = model.forward(batch, k_fwd, is_train=1)
    loss = jax.block_until_ready(loss)
    assert np.isfinite(float(loss))
    print("KERNEL_OK")
</pallas_src>

<mosaic_0001>
module attributes {stable_mosaic.version = 11 : i64} {
  func.func @_fused_sadi_loss_kernel(%arg0: memref<2xf32, #tpu.memory_space<smem>>, %arg1: memref<2xf32, #tpu.memory_space<smem>>, %arg2: memref<2x8x16xf32, #tpu.memory_space<vmem>>, %arg3: memref<2x8x16xf32, #tpu.memory_space<vmem>>, %arg4: memref<2x8x16xf32, #tpu.memory_space<vmem>>, %arg5: memref<2x8x16xf32, #tpu.memory_space<vmem>>, %arg6: memref<64x48xf32, #tpu.memory_space<vmem>>, %arg7: memref<1x48xf32, #tpu.memory_space<vmem>>, %arg8: memref<2x48xf32, #tpu.memory_space<vmem>>, %arg9: memref<1x1xf32, #tpu.memory_space<smem>>) attributes {dimension_semantics = [], scalar_prefetch = 0 : i64, scratch_operands = 0 : i64, tpu.core_type = #tpu.core_type<tc>} {
    %c0 = arith.constant 0 : index
    %c0_0 = arith.constant 0 : index
    %0 = vector.load %arg6[%c0, %c0_0] : memref<64x48xf32, #tpu.memory_space<vmem>>, vector<64x48xf32>
    %1 = vector.extract_strided_slice %0 {offsets = [0, 0], sizes = [16, 48], strides = [1, 1]} : vector<64x48xf32> to vector<16x48xf32>
    %2 = arith.truncf %1 : vector<16x48xf32> to vector<16x48xbf16>
    %3 = vector.extract_strided_slice %0 {offsets = [16, 0], sizes = [16, 48], strides = [1, 1]} : vector<64x48xf32> to vector<16x48xf32>
    %4 = arith.truncf %3 : vector<16x48xf32> to vector<16x48xbf16>
    %5 = vector.extract_strided_slice %0 {offsets = [32, 0], sizes = [16, 48], strides = [1, 1]} : vector<64x48xf32> to vector<16x48xf32>
    %6 = arith.truncf %5 : vector<16x48xf32> to vector<16x48xbf16>
    %7 = vector.extract_strided_slice %0 {offsets = [48, 0], sizes = [16, 48], strides = [1, 1]} : vector<64x48xf32> to vector<16x48xf32>
    %8 = arith.truncf %7 : vector<16x48xf32> to vector<16x48xbf16>
    %c0_1 = arith.constant 0 : index
    %c0_2 = arith.constant 0 : index
    %9 = vector.load %arg7[%c0_1, %c0_2] : memref<1x48xf32, #tpu.memory_space<vmem>>, vector<1x48xf32>
    %c0_3 = arith.constant 0 : index
    %c0_4 = arith.constant 0 : index
    %10 = vector.load %arg8[%c0_3, %c0_4] : memref<2x48xf32, #tpu.memory_space<vmem>>, vector<2x48xf32>
    %c0_5 = arith.constant 0 : index
    %c0_6 = arith.constant 0 : index
    %c0_7 = arith.constant 0 : index
    %11 = vector.load %arg2[%c0_5, %c0_6, %c0_7] : memref<2x8x16xf32, #tpu.memory_space<vmem>>, vector<1x8x16xf32>
    %12 = vector.shape_cast %11 : vector<1x8x16xf32> to vector<8x16xf32>
    %c0_8 = arith.constant 0 : index
    %c0_9 = arith.constant 0 : index
    %c0_10 = arith.constant 0 : index
    %13 = vector.load %arg3[%c0_8, %c0_9, %c0_10] : memref<2x8x16xf32, #tpu.memory_space<vmem>>, vector<1x8x16xf32>
    %14 = vector.shape_cast %13 : vector<1x8x16xf32> to vector<8x16xf32>
    %c0_11 = arith.constant 0 : index
    %c0_12 = arith.constant 0 : index
    %c0_13 = arith.constant 0 : index
    %15 = vector.load %arg4[%c0_11, %c0_12, %c0_13] : memref<2x8x16xf32, #tpu.memory_space<vmem>>, vector<1x8x16xf32>
    %16 = vector.shape_cast %15 : vector<1x8x16xf32> to vector<8x16xf32>
    %c0_14 = arith.constant 0 : index
    %c0_15 = arith.constant 0 : index
    %c0_16 = arith.constant 0 : index
    %17 = vector.load %arg5[%c0_14, %c0_15, %c0_16] : memref<2x8x16xf32, #tpu.memory_space<vmem>>, vector<1x8x16xf32>
    %18 = vector.shape_cast %17 : vector<1x8x16xf32> to vector<8x16xf32>
    %c0_17 = arith.constant 0 : index
    %19 = memref.load %arg0[%c0_17] : memref<2xf32, #tpu.memory_space<smem>>
    %c0_18 = arith.constant 0 : index
    %20 = memref.load %arg1[%c0_18] : memref<2xf32, #tpu.memory_space<smem>>
    %cst = arith.constant 1.000000e+00 : f32
    %21 = vector.broadcast %cst : f32 to vector<8x16xf32>
    %22 = arith.subf %21, %14 : vector<8x16xf32>
    %23 = vector.broadcast %19 : f32 to vector<8x16xf32>
    %24 = arith.mulf %23, %12 : vector<8x16xf32>
    %25 = vector.broadcast %20 : f32 to vector<8x16xf32>
    %26 = arith.mulf %25, %18 : vector<8x16xf32>
    %27 = arith.addf %24, %26 : vector<8x16xf32>
    %28 = arith.mulf %14, %12 : vector<8x16xf32>
    %29 = arith.mulf %22, %27 : vector<8x16xf32>
    %30 = arith.truncf %28 : vector<8x16xf32> to vector<8x16xbf16>
    %cst_19 = arith.constant dense<0.000000e+00> : vector<8x48xf32>
    %31 = tpu.matmul %30, %2, %cst_19 {dimension_numbers = #tpu.dot_dimension_numbers<[1], [0], [0], [1], [0, 0, 1, 1], [], []>} : vector<8x16xbf16>, vector<16x48xbf16>, vector<8x48xf32> -> vector<8x48xf32>
    %32 = arith.truncf %29 : vector<8x16xf32> to vector<8x16xbf16>
    %cst_20 = arith.constant dense<0.000000e+00> : vector<8x48xf32>
    %33 = tpu.matmul %32, %4, %cst_20 {dimension_numbers = #tpu.dot_dimension_numbers<[1], [0], [0], [1], [0, 0, 1, 1], [], []>} : vector<8x16xbf16>, vector<16x48xbf16>, vector<8x48xf32> -> vector<8x48xf32>
    %34 = arith.addf %31, %33 : vector<8x48xf32>
    %35 = arith.truncf %14 : vector<8x16xf32> to vector<8x16xbf16>
    %cst_21 = arith.constant dense<0.000000e+00> : vector<8x48xf32>
    %36 = tpu.matmul %35, %6, %cst_21 {dimension_numbers = #tpu.dot_dimension_numbers<[1], [0], [0], [1], [0, 0, 1, 1], [], []>} : vector<8x16xbf16>, vector<16x48xbf16>, vector<8x48xf32> -> vector<8x48xf32>
    %37 = arith.addf %34, %36 : vector<8x48xf32>
    %38 = arith.truncf %22 : vector<8x16xf32> to vector<8x16xbf16>
    %cst_22 = arith.constant dense<0.000000e+00> : vector<8x48xf32>
    %39 = tpu.matmul %38, %8, %cst_22 {dimension_numbers = #tpu.dot_dimension_numbers<[1], [0], [0], [1], [0, 0, 1, 1], [], []>} : vector<8x16xbf16>, vector<16x48xbf16>, vector<8x48xf32> -> vector<8x48xf32>
    %40 = arith.addf %37, %39 : vector<8x48xf32>
    %41 = vector.broadcast %9 : vector<1x48xf32> to vector<8x48xf32>
    %42 = arith.addf %40, %41 : vector<8x48xf32>
    %43 = vector.extract_strided_slice %10 {offsets = [0, 0], sizes = [1, 48], strides = [1, 1]} : vector<2x48xf32> to vector<1x48xf32>
    %44 = vector.broadcast %43 : vector<1x48xf32> to vector<8x48xf32>
    %45 = arith.addf %42, %44 : vector<8x48xf32>
    %46 = vector.extract_strided_slice %45 {offsets = [0, 0], sizes = [8, 16], strides = [1, 1]} : vector<8x48xf32> to vector<8x16xf32>
    %47 = vector.extract_strided_slice %45 {offsets = [0, 16], sizes = [8, 16], strides = [1, 1]} : vector<8x48xf32> to vector<8x16xf32>
    %48 = vector.extract_strided_slice %45 {offsets = [0, 32], sizes = [8, 16], strides = [1, 1]} : vector<8x48xf32> to vector<8x16xf32>
    %49 = arith.subf %16, %14 : vector<8x16xf32>
    %50 = arith.subf %18, %46 : vector<8x16xf32>
    %51 = arith.mulf %50, %49 : vector<8x16xf32>
    %52 = arith.subf %18, %47 : vector<8x16xf32>
    %53 = arith.mulf %52, %49 : vector<8x16xf32>
    %54 = arith.subf %18, %48 : vector<8x16xf32>
    %55 = arith.mulf %54, %49 : vector<8x16xf32>
    %56 = arith.mulf %51, %51 : vector<8x16xf32>
    %57 = vector.shape_cast %56 : vector<8x16xf32> to vector<1x8x16xf32>
    %cst_23 = arith.constant dense<0.000000e+00> : vector<1xf32>
    %58 = vector.multi_reduction <add>, %57, %cst_23 [1, 2] : vector<1x8x16xf32> to vector<1xf32>
    %59 = vector.shape_cast %58 : vector<1xf32> to vector<1x1x1xf32>
    %60 = vector.extract %59[0, 0, 0] : f32 from vector<1x1x1xf32>
    %cst_24 = arith.constant 0.000000e+00 : f32
    %61 = arith.addf %cst_24, %60 : f32
    %62 = arith.mulf %53, %53 : vector<8x16xf32>
    %63 = vector.shape_cast %62 : vector<8x16xf32> to vector<1x8x16xf32>
    %cst_25 = arith.constant dense<0.000000e+00> : vector<1xf32>
    %64 = vector.multi_reduction <add>, %63, %cst_25 [1, 2] : vector<1x8x16xf32> to vector<1xf32>
    %65 = vector.shape_cast %64 : vector<1xf32> to vector<1x1x1xf32>
    %66 = vector.extract %65[0, 0, 0] : f32 from vector<1x1x1xf32>
    %cst_26 = arith.constant 0.000000e+00 : f32
    %67 = arith.addf %cst_26, %66 : f32
    %68 = arith.mulf %55, %55 : vector<8x16xf32>
    %69 = vector.shape_cast %68 : vector<8x16xf32> to vector<1x8x16xf32>
    %cst_27 = arith.constant dense<0.000000e+00> : vector<1xf32>
    %70 = vector.multi_reduction <add>, %69, %cst_27 [1, 2] : vector<1x8x16xf32> to vector<1xf32>
    %71 = vector.shape_cast %70 : vector<1xf32> to vector<1x1x1xf32>
    %72 = vector.extract %71[0, 0, 0] : f32 from vector<1x1x1xf32>
    %cst_28 = arith.constant 0.000000e+00 : f32
    %73 = arith.addf %cst_28, %72 : f32
    %74 = vector.shape_cast %49 : vector<8x16xf32> to vector<1x8x16xf32>
    %cst_29 = arith.constant dense<0.000000e+00> : vector<1xf32>
    %75 = vector.multi_reduction <add>, %74, %cst_29 [1, 2] : vector<1x8x16xf32> to vector<1xf32>
    %76 = vector.shape_cast %75 : vector<1xf32> to vector<1x1x1xf32>
    %77 = vector.extract %76[0, 0, 0] : f32 from vector<1x1x1xf32>
    %cst_30 = arith.constant 0.000000e+00 : f32
    %78 = arith.addf %cst_30, %77 : f32
    %c1 = arith.constant 1 : index
    %c0_31 = arith.constant 0 : index
    %c0_32 = arith.constant 0 : index
    %79 = vector.load %arg2[%c1, %c0_31, %c0_32] : memref<2x8x16xf32, #tpu.memory_space<vmem>>, vector<1x8x16xf32>
    %80 = vector.shape_cast %79 : vector<1x8x16xf32> to vector<8x16xf32>
    %c1_33 = arith.constant 1 : index
    %c0_34 = arith.constant 0 : index
    %c0_35 = arith.constant 0 : index
    %81 = vector.load %arg3[%c1_33, %c0_34, %c0_35] : memref<2x8x16xf32, #tpu.memory_space<vmem>>, vector<1x8x16xf32>
    %82 = vector.shape_cast %81 : vector<1x8x16xf32> to vector<8x16xf32>
    %c1_36 = arith.constant 1 : index
    %c0_37 = arith.constant 0 : index
    %c0_38 = arith.constant 0 : index
    %83 = vector.load %arg4[%c1_36, %c0_37, %c0_38] : memref<2x8x16xf32, #tpu.memory_space<vmem>>, vector<1x8x16xf32>
    %84 = vector.shape_cast %83 : vector<1x8x16xf32> to vector<8x16xf32>
    %c1_39 = arith.constant 1 : index
    %c0_40 = arith.constant 0 : index
    %c0_41 = arith.constant 0 : index
    %85 = vector.load %arg5[%c1_39, %c0_40, %c0_41] : memref<2x8x16xf32, #tpu.memory_space<vmem>>, vector<1x8x16xf32>
    %86 = vector.shape_cast %85 : vector<1x8x16xf32> to vector<8x16xf32>
    %c1_42 = arith.constant 1 : index
    %87 = memref.load %arg0[%c1_42] : memref<2xf32, #tpu.memory_space<smem>>
    %c1_43 = arith.constant 1 : index
    %88 = memref.load %arg1[%c1_43] : memref<2xf32, #tpu.memory_space<smem>>
    %cst_44 = arith.constant 1.000000e+00 : f32
    %89 = vector.broadcast %cst_44 : f32 to vector<8x16xf32>
    %90 = arith.subf %89, %82 : vector<8x16xf32>
    %91 = vector.broadcast %87 : f32 to vector<8x16xf32>
    %92 = arith.mulf %91, %80 : vector<8x16xf32>
    %93 = vector.broadcast %88 : f32 to vector<8x16xf32>
    %94 = arith.mulf %93, %86 : vector<8x16xf32>
    %95 = arith.addf %92, %94 : vector<8x16xf32>
    %96 = arith.mulf %82, %80 : vector<8x16xf32>
    %97 = arith.mulf %90, %95 : vector<8x16xf32>
    %98 = arith.truncf %96 : vector<8x16xf32> to vector<8x16xbf16>
    %cst_45 = arith.constant dense<0.000000e+00> : vector<8x48xf32>
    %99 = tpu.matmul %98, %2, %cst_45 {dimension_numbers = #tpu.dot_dimension_numbers<[1], [0], [0], [1], [0, 0, 1, 1], [], []>} : vector<8x16xbf16>, vector<16x48xbf16>, vector<8x48xf32> -> vector<8x48xf32>
    %100 = arith.truncf %97 : vector<8x16xf32> to vector<8x16xbf16>
    %cst_46 = arith.constant dense<0.000000e+00> : vector<8x48xf32>
    %101 = tpu.matmul %100, %4, %cst_46 {dimension_numbers = #tpu.dot_dimension_numbers<[1], [0], [0], [1], [0, 0, 1, 1], [], []>} : vector<8x16xbf16>, vector<16x48xbf16>, vector<8x48xf32> -> vector<8x48xf32>
    %102 = arith.addf %99, %101 : vector<8x48xf32>
    %103 = arith.truncf %82 : vector<8x16xf32> to vector<8x16xbf16>
    %cst_47 = arith.constant dense<0.000000e+00> : vector<8x48xf32>
    %104 = tpu.matmul %103, %6, %cst_47 {dimension_numbers = #tpu.dot_dimension_numbers<[1], [0], [0], [1], [0, 0, 1, 1], [], []>} : vector<8x16xbf16>, vector<16x48xbf16>, vector<8x48xf32> -> vector<8x48xf32>
    %105 = arith.addf %102, %104 : vector<8x48xf32>
    %106 = arith.truncf %90 : vector<8x16xf32> to vector<8x16xbf16>
    %cst_48 = arith.constant dense<0.000000e+00> : vector<8x48xf32>
    %107 = tpu.matmul %106, %8, %cst_48 {dimension_numbers = #tpu.dot_dimension_numbers<[1], [0], [0], [1], [0, 0, 1, 1], [], []>} : vector<8x16xbf16>, vector<16x48xbf16>, vector<8x48xf32> -> vector<8x48xf32>
    %108 = arith.addf %105, %107 : vector<8x48xf32>
    %109 = vector.broadcast %9 : vector<1x48xf32> to vector<8x48xf32>
    %110 = arith.addf %108, %109 : vector<8x48xf32>
    %111 = vector.extract_strided_slice %10 {offsets = [1, 0], sizes = [1, 48], strides = [1, 1]} : vector<2x48xf32> to vector<1x48xf32>
    %112 = vector.broadcast %111 : vector<1x48xf32> to vector<8x48xf32>
    %113 = arith.addf %110, %112 : vector<8x48xf32>
    %114 = vector.extract_strided_slice %113 {offsets = [0, 0], sizes = [8, 16], strides = [1, 1]} : vector<8x48xf32> to vector<8x16xf32>
    %115 = vector.extract_strided_slice %113 {offsets = [0, 16], sizes = [8, 16], strides = [1, 1]} : vector<8x48xf32> to vector<8x16xf32>
    %116 = vector.extract_strided_slice %113 {offsets = [0, 32], sizes = [8, 16], strides = [1, 1]} : vector<8x48xf32> to vector<8x16xf32>
    %117 = arith.subf %84, %82 : vector<8x16xf32>
    %118 = arith.subf %86, %114 : vector<8x16xf32>
    %119 = arith.mulf %118, %117 : vector<8x16xf32>
    %120 = arith.subf %86, %115 : vector<8x16xf32>
    %121 = arith.mulf %120, %117 : vector<8x16xf32>
    %122 = arith.subf %86, %116 : vector<8x16xf32>
    %123 = arith.mulf %122, %117 : vector<8x16xf32>
    %124 = arith.mulf %119, %119 : vector<8x16xf32>
    %125 = vector.shape_cast %124 : vector<8x16xf32> to vector<1x8x16xf32>
    %cst_49 = arith.constant dense<0.000000e+00> : vector<1xf32>
    %126 = vector.multi_reduction <add>, %125, %cst_49 [1, 2] : vector<1x8x16xf32> to vector<1xf32>
    %127 = vector.shape_cast %126 : vector<1xf32> to vector<1x1x1xf32>
    %128 = vector.extract %127[0, 0, 0] : f32 from vector<1x1x1xf32>
    %129 = arith.addf %61, %128 : f32
    %130 = arith.mulf %121, %121 : vector<8x16xf32>
    %131 = vector.shape_cast %130 : vector<8x16xf32> to vector<1x8x16xf32>
    %cst_50 = arith.constant dense<0.000000e+00> : vector<1xf32>
    %132 = vector.multi_reduction <add>, %131, %cst_50 [1, 2] : vector<1x8x16xf32> to vector<1xf32>
    %133 = vector.shape_cast %132 : vector<1xf32> to vector<1x1x1xf32>
    %134 = vector.extract %133[0, 0, 0] : f32 from vector<1x1x1xf32>
    %135 = arith.addf %67, %134 : f32
    %136 = arith.mulf %123, %123 : vector<8x16xf32>
    %137 = vector.shape_cast %136 : vector<8x16xf32> to vector<1x8x16xf32>
    %cst_51 = arith.constant dense<0.000000e+00> : vector<1xf32>
    %138 = vector.multi_reduction <add>, %137, %cst_51 [1, 2] : vector<1x8x16xf32> to vector<1xf32>
    %139 = vector.shape_cast %138 : vector<1xf32> to vector<1x1x1xf32>
    %140 = vector.extract %139[0, 0, 0] : f32 from vector<1x1x1xf32>
    %141 = arith.addf %73, %140 : f32
    %142 = vector.shape_cast %117 : vector<8x16xf32> to vector<1x8x16xf32>
    %cst_52 = arith.constant dense<0.000000e+00> : vector<1xf32>
    %143 = vector.multi_reduction <add>, %142, %cst_52 [1, 2] : vector<1x8x16xf32> to vector<1xf32>
    %144 = vector.shape_cast %143 : vector<1xf32> to vector<1x1x1xf32>
    %145 = vector.extract %144[0, 0, 0] : f32 from vector<1x1x1xf32>
    %146 = arith.addf %78, %145 : f32
    %cst_53 = arith.constant 0.000000e+00 : f32
    %147 = arith.cmpf ogt, %146, %cst_53 : f32
    %cst_54 = arith.constant 1.000000e+00 : f32
    %148 = arith.select %147, %146, %cst_54 : f32
    %149 = arith.addf %129, %135 : f32
    %cst_55 = arith.constant 5.000000e-01 : f32
    %150 = arith.mulf %cst_55, %149 : f32
    %cst_56 = arith.constant 1.000000e+00 : f32
    %151 = arith.mulf %cst_56, %141 : f32
    %cst_57 = arith.constant 1.000000e+00 : f32
    %152 = arith.mulf %cst_57, %150 : f32
    %153 = arith.addf %151, %152 : f32
    %cst_58 = arith.constant 2.000000e+00 : f32
    %154 = arith.mulf %cst_58, %148 : f32
    %155 = arith.divf %153, %154 : f32
    %c0_59 = arith.constant 0 : index
    %c0_60 = arith.constant 0 : index
    %156 = memref.load %arg9[%c0_59, %c0_60] : memref<1x1xf32, #tpu.memory_space<smem>>
    memref.store %155, %arg9[%c0_59, %c0_60] : memref<1x1xf32, #tpu.memory_space<smem>>
    return
  }
}

</mosaic_0001>

<bundles_post_ra>
// kernel: tpu_custom_call.1
= control target key start
LH: loop header
LB: loop body
LE: loop exit
PB: predicated region body
PF: predicated region fallthrough
CT: control target
= control target key end

     0   :  { %14 = vsyncpa [#allocation4], 0  ;;  %s974_s0 = inlined_call_operand.vmem [shape: f32[2], index: 0, kind: input, shape index: {}]   ;;  %s975_s1 = inlined_call_operand.vmem [shape: f32[2], index: 1, kind: input, shape index: {}]   ;;  %s976_s2 = inlined_call_operand.vmem [shape: f32[2,8,16], index: 2, kind: input, shape index: {}]   ;;  %s977_s3 = inlined_call_operand.vmem [shape: f32[2,8,16], index: 3, kind: input, shape index: {}]   ;;  %s978_s4 = inlined_call_operand.vmem [shape: f32[2,8,16], index: 4, kind: input, shape index: {}]   ;;  %s979_s5 = inlined_call_operand.vmem [shape: f32[2,8,16], index: 5, kind: input, shape index: {}]   ;;  %s980_s6 = inlined_call_operand.vmem [shape: f32[64,48], index: 6, kind: input, shape index: {}]   ;;  %s981_s7 = inlined_call_operand.vmem [shape: f32[1,48], index: 7, kind: input, shape index: {}]   ;;  %s982_s8 = inlined_call_operand.vmem [shape: f32[2,48], index: 8, kind: input, shape index: {}]   ;;  %s983_s9 = inlined_call_operand.hbm [shape: f32[1,1], index: 9, kind: output, shape index: {}]  }
   0x1   :  { %15 = vsyncpa [#allocation6], 0 }
   0x2   :  { %16 = vsyncpa [#allocation3], 0  ;;  %s23_s11 = sshll.u32 %s974_s0, 4  ;;  %s33_s14 = sshll.u32 %s975_s1, 4  ;;  %s24_s11 = int_to_ptr.vmem [resolvable:$true] %s23_s11  ;;  %s34_s14 = int_to_ptr.vmem [resolvable:$true] %s33_s14 }
   0x3   :  { %s735_s15 = scalar_lea.vmem %s24_s11, 16  ;;  %p740_p1 = scmp.lt.s32.totalorder %s24_s11, %s24_s11 }
   0x4   :  { %p736_p0 = scmp.ne.s32.totalorder %s24_s11, %s735_s15  ;;  %p741_p2 = scmp.lt.s32.totalorder %s735_s15, %s735_s15 }
   0x6   :  { %p742_p3 = por %p741_p2, %p740_p1 }
   0x8   :  { %p743_p4 = pnand %p742_p3, %p736_p0 }
   0xa   :  { %746 = shalt.err (!%p743_p4)
}
   0xb   :  { %s775_s16 = smov [#allocation2]   ;;  %s747_s17 = scalar_lea.vmem %s34_s14, 16 }
   0xc   :  { %26 = dma.vmem_to_smem %s24_s11, 16, %s775_s16, [#allocation4]  }
   0xd   :  { %p748_p5 = scmp.ne.s32.totalorder %s34_s14, %s747_s17  ;;  %p752_p6 = scmp.lt.s32.totalorder %s34_s14, %s34_s14 }
   0xe   :  { %p753_p7 = scmp.lt.s32.totalorder %s747_s17, %s747_s17 }
  0x10   :  { %p754_p8 = por %p753_p7, %p752_p6 }
  0x12   :  { %p755_p9 = pnand %p754_p8, %p748_p5 }
  0x14   :  { %758 = shalt.err (!%p755_p9)
}
  0x15   :  { %s776_s0 = smov [#allocation5]  }
  0x16   :  { %36 = dma.vmem_to_smem %s34_s14, 16, %s776_s0, [#allocation6]  }
  0x17   :  { %769 = dma.done.wait [#allocation4], 16  }
  0x18   :  { %770 = vsyncadd [#allocation4], 4294967280 }
  0x19   :  { %771 = dma.done.wait [#allocation6], 16  }
  0x1a   :  { %772 = vsyncadd [#allocation6], 4294967280 }
  0x1b   :  { %57 = sfence }
  0x1c   :  { %v61_v0 = vld [vmem:[%s980_s6 + $0x10] sm:$0xff]  ;;  %v62_v1 = vld [vmem:[%s980_s6 + $0x18] sm:$0xff]  ;;  %v59_v2 = vld [vmem:[%s980_s6] sm:$0xff]  ;;  %v777_v3 = vmov 0.0   ;;  %s77_s29 = sld [smem:[#allocation2]]  ;;  %vm778_vm0 = vmmov 0   ;;  %v273_v49 = vlaneseq }
  0x1d   :  { %660 = vmatprep.subr.bf16.mxu0 %v777_v3  ;;  %666 = vmatprep.subr.bf16.mxu1 %v777_v3  ;;  %v849_v4 = vpack.c.bf16 %v62_v1, %v61_v0  ;;  %v60_v5 = vld [vmem:[%s980_s6 + $0x8] sm:$0xff]  ;;  %v73_v6 = vld [vmem:[%s976_s2] sm:$0xff]  ;;  %s78_s30 = sld [smem:[#allocation5]]  ;;  %v65_v10 = vld [vmem:[%s980_s6 + $0x30] sm:$0xff]  ;;  %vm89_vm1 = vcmask 130048   ;;  %s638_s16 = sld [smem:[#allocation2 + $0x1]] }
  0x1e   :  { %v860_v7 = vld [vmem:[%s977_s3] sm:$0xff]  ;;  %v67_v8 = vpack.c.bf16 %v60_v5, %v59_v2  ;;  %668 = vmatprep.mubr.msk.bf16.mxu1 %vm778_vm0, %v777_v3  ;;  %662 = vmatprep.mubr.msk.bf16.mxu0 %vm778_vm0, %v777_v3  ;;  %v66_v11 = vld [vmem:[%s980_s6 + $0x38] sm:$0xff]  ;;  %s639_s17 = sld [smem:[#allocation5 + $0x1]]  ;;  %v64_v22 = vld [vmem:[%s980_s6 + $0x28] sm:$0xff]  ;;  %v274_v57 = vshrl.u32 %v273_v49, 7  ;;  %s780_s26 = smov 96  }
  0x1f   :  { %v85_v9 = vmul.f32 %v860_v7, %v73_v6  ;;  %661 = vmatpush3.bf16.msra.mxu0 %v849_v4  ;;  %v70_v13 = vpack.c.bf16 %v66_v11, %v65_v10  ;;  %v879_v14 = vld [vmem:[%s979_s5] sm:$0xff]  ;;  %v79_v18 = vsub.f32 1.0, %v860_v7  ;;  %v896_v24 = vld [vmem:[%s977_s3 + $0x8] sm:$0xff]  ;;  %v176_v36 = vpack.c.bf16 %v860_v7, %v860_v7 }
  0x20   :  { %667 = vmatpush3.bf16.msra.mxu1 %v67_v8  ;;  %672 = vmatprep.subr.bf16.mxu0 %v777_v3  ;;  %v63_v21 = vld [vmem:[%s980_s6 + $0x20] sm:$0xff]  ;;  %v634_v27 = vld [vmem:[%s976_s2 + $0x8] sm:$0xff]  ;;  %v349_v37 = vsub.f32 1.0, %v896_v24  ;;  %v445_v42 = vpack.c.bf16 %v896_v24, %v896_v24  ;;  %v275_v60 = vsub.s32 0, %v274_v57  ;;  %s759_s2 = scalar_lea.hbm %s983_s9, 16 }
  0x21   :  { %v87_v12 = vpack.c.bf16 %v85_v9, %v85_v9  ;;  %678 = vmatprep.subr.bf16.mxu1 %v777_v3  ;;  %v221_v23 = vpack.c.bf16 %v79_v18, %v79_v18  ;;  %v69_v26 = vpack.c.bf16 %v64_v22, %v63_v21  ;;  %v904_v29 = vld [vmem:[%s979_s5 + $0x8] sm:$0xff]  ;;  %v355_v32 = vmul.f32 %v896_v24, %v634_v27  ;;  %v72_v62 = vld [vmem:[%s982_s8] sm:$0x3]  ;;  %s779_s8 = smov 112   ;;  %p760_p11 = scmp.ne.s32.totalorder %s983_s9, %s759_s2 }
  0x22   :  { %v80_v15 = vstv %s77_s29  ;;  %v490_v40 = vpack.c.bf16 %v349_v37, %v349_v37  ;;  %v538_v21 = vsub.s32 1, %v274_v57  ;;  %p763_p12 = scmp.lt.u32.totalorder %s759_s2, %s983_s9 }
  0x23   :  { %669 = vmatmul.mubr.msk.bf16.vlgmr.msra.gmra.mrb[0].mxu1 %vm89_vm1, %v87_v12  ;;  %v81_v16 = vmul.f32 %v80_v15, %v73_v6  ;;  %v82_v17 = vstv %s78_s30  ;;  %v350_v28 = vstv %s638_s16  ;;  %v357_v35 = vpack.c.bf16 %v355_v32, %v355_v32 }
  0x24   :  { %679 = vmatpush3.bf16.msra.mxu1 %v70_v13  ;;  %680 = vmatprep.mubr.msk.bf16.mxu1 %vm778_vm0, %v777_v3  ;;  %v83_v19 = vmul.f32 %v82_v17, %v879_v14  ;;  %v352_v30 = vstv %s639_s17  ;;  %v351_v33 = vmul.f32 %v634_v27, %v350_v28  ;;  %p765_p13 = pnand %p763_p12, %p760_p11 }
  0x25   :  { %690 = vmatprep.subr.bf16.mxu1 %v777_v3  ;;  %v353_v34 = vmul.f32 %v904_v29, %v352_v30  ;;  %v539_v30 = vrot.slane %v72_v62, %v538_v21 }
  0x26   :  { %v84_v20 = vadd.f32 %v83_v19, %v81_v16 }
  0x27   :  { %v354_v38 = vadd.f32 %v353_v34, %v351_v33  ;;  %v75_v33 = vld [vmem:[%s978_s4] sm:$0xff] }
  0x28   :  { %v86_v25 = vmul.f32 %v84_v20, %v79_v18  ;;  %v278_v34 = vsub.f32 %v75_v33, %v860_v7 }
  0x29   :  { %v356_v39 = vmul.f32 %v354_v38, %v349_v37 }
  0x2a   :  { %v88_v31 = vpack.c.bf16 %v86_v25, %v86_v25 }
  0x2b   :  { %681 = vmatmul.mubr.msk.bf16.vlgmr.msra.gmra.mrb[4].mxu1 %vm89_vm1, %v221_v23  ;;  %v358_v41 = vpack.c.bf16 %v356_v39, %v356_v39  ;;  %v328_v39 = vsel %vm89_vm1, %v278_v34, 0.0 }
  0x2c   :  { %691 = vmatpush3.bf16.msra.mxu1 %v67_v8  ;;  %692 = vmatprep.mubr.msk.bf16.mxu1 %vm778_vm0, %v777_v3  ;;  %v276_v8 = vrot.slane %v72_v62, %v275_v60 }
  0x2d   :  { %663 = vmatmul.mubr.msk.bf16.vlgmr.msra.gmra.mrb[0].mxu0 %vm89_vm1, %v88_v31  ;;  %702 = vmatprep.subr.bf16.mxu1 %v777_v3 }
  0x2e   :  { %673 = vmatpush3.bf16.msra.mxu0 %v69_v26  ;;  %674 = vmatprep.mubr.msk.bf16.mxu0 %vm778_vm0, %v777_v3 }
  0x2f   :  { %684 = vmatprep.subr.bf16.mxu0 %v777_v3 }
  0x33   :  { %693 = vmatmul.mubr.msk.bf16.vlgmr.msra.gmra.mrb[8].mxu1 %vm89_vm1, %v357_v35 }
  0x34   :  { %703 = vmatpush3.bf16.msra.mxu1 %v70_v13  ;;  %704 = vmatprep.mubr.msk.bf16.mxu1 %vm778_vm0, %v777_v3 }
  0x35   :  { %675 = vmatmul.mubr.msk.bf16.vlgmr.msra.gmra.mrb[4].mxu0 %vm89_vm1, %v176_v36 }
  0x36   :  { %685 = vmatpush3.bf16.msra.mxu0 %v849_v4  ;;  %686 = vmatprep.mubr.msk.bf16.mxu0 %vm778_vm0, %v777_v3 }
  0x37   :  { %696 = vmatprep.subr.bf16.mxu0 %v777_v3 }
  0x3b   :  { %705 = vmatmul.mubr.msk.bf16.vlgmr.msra.gmra.mrb[12].mxu1 %vm89_vm1, %v490_v40  ;;  %v636_v40 = vld [vmem:[%s978_s4 + $0x8] sm:$0xff] }
  0x3d   :  { %687 = vmatmul.mubr.msk.bf16.vlgmr.msra.gmra.mrb[8].mxu0 %vm89_vm1, %v358_v41  ;;  %v541_v41 = vsub.f32 %v636_v40, %v896_v24 }
  0x3e   :  { %697 = vmatpush3.bf16.msra.mxu0 %v69_v26  ;;  %698 = vmatprep.mubr.msk.bf16.mxu0 %vm778_vm0, %v777_v3  ;;  %v633_v3 = vld [vmem:[%s981_s7] ss:$0 sm:$0xff] }
  0x45   :  { %699 = vmatmul.mubr.msk.bf16.vlgmr.msra.gmra.mrb[12].mxu0 %vm89_vm1, %v445_v42 }
  0xf6   :  { %v170_v43 = vpop.f32.mrb[0].mxu1 }
  0xf7   :  { %v670_v44 = vpop.f32.mrb[1].mxu1 }
  0xf8   :  { %v173_v45 = vpop.f32.mrb[2].mxu1 }
  0xf9   :  { %v671_v46 = vpop.f32.mrb[3].mxu1 }
  0xfe   :  { %v259_v47 = vpop.f32.mrb[4].mxu1 }
  0xff   :  { %v682_v48 = vpop.f32.mrb[5].mxu1 }
 0x100   :  { %v127_v50 = vpop.f32.mrb[0].mxu0  ;;  %v262_v51 = vpop.f32.mrb[6].mxu1 }
 0x101   :  { %v171_v52 = vadd.f32 %v170_v43, %v127_v50  ;;  %v664_v53 = vpop.f32.mrb[1].mxu0  ;;  %v683_v54 = vpop.f32.mrb[7].mxu1 }
 0x102   :  { %v130_v55 = vpop.f32.mrb[2].mxu0 }
 0x103   :  { %v665_v56 = vpop.f32.mrb[3].mxu0 }
 0x106   :  { %v439_v58 = vpop.f32.mrb[8].mxu1 }
 0x107   :  { %v694_v59 = vpop.f32.mrb[9].mxu1 }
 0x108   :  { %v214_v61 = vpop.f32.mrb[4].mxu0  ;;  %v442_v63 = vpop.f32.mrb[10].mxu1 }
 0x109   :  { %v220_v0 = vadd.f32 %v214_v61, %v171_v52  ;;  %v676_v1 = vpop.f32.mrb[5].mxu0  ;;  %v695_v2 = vpop.f32.mrb[11].mxu1  ;;  %v591_v61 = vsel %vm89_vm1, %v541_v41, 0.0 }
 0x10a   :  { %v217_v4 = vpop.f32.mrb[6].mxu0 }
 0x10b   :  { %v265_v5 = vadd.f32 %v259_v47, %v220_v0  ;;  %v677_v6 = vpop.f32.mrb[7].mxu0 }
 0x10d   :  { %v272_v9 = vadd.f32 %v633_v3, %v265_v5 }
 0x10e   :  { %v528_v10 = vpop.f32.mrb[12].mxu1 }
 0x10f   :  { %v277_v11 = vadd.f32 %v276_v8, %v272_v9  ;;  %v706_v12 = vpop.f32.mrb[13].mxu1 }
 0x110   :  { %v396_v13 = vpop.f32.mrb[8].mxu0  ;;  %v531_v15 = vpop.f32.mrb[14].mxu1 }
 0x111   :  { %v440_v16 = vadd.f32 %v439_v58, %v396_v13  ;;  %v688_v17 = vpop.f32.mrb[9].mxu0  ;;  %282 = vrot.lane.b32.xlu0 %v277_v11, %s779_s8  ;;  %v707_v18 = vpop.f32.mrb[15].mxu1  ;;  %v279_v35 = vsub.f32 %v879_v14, %v277_v11 }
 0x112   :  { %v399_v19 = vpop.f32.mrb[10].mxu0 }
 0x113   :  { %v689_v20 = vpop.f32.mrb[11].mxu0  ;;  %v280_v36 = vmul.f32 %v279_v35, %v278_v34 }
 0x115   :  { %287 = vrot.lane.b32.xlu0 %v277_v11, %s780_s26  ;;  %v292_v37 = vmul.f32 %v280_v36, %v280_v36 }
 0x117   :  { %v293_v38 = vsel %vm89_vm1, %v292_v37, 0.0 }
 0x118   :  { %v483_v22 = vpop.f32.mrb[12].mxu0 }
 0x119   :  { %v489_v23 = vadd.f32 %v483_v22, %v440_v16  ;;  %v700_v25 = vpop.f32.mrb[13].mxu0 }
 0x11a   :  { %v486_v26 = vpop.f32.mrb[14].mxu0 }
 0x11b   :  { %v534_v27 = vadd.f32 %v528_v10, %v489_v23  ;;  %v701_v28 = vpop.f32.mrb[15].mxu0 }
 0x11d   :  { %v535_v31 = vadd.f32 %v633_v3, %v534_v27 }
 0x11f   :  { %v540_v32 = vadd.f32 %v539_v30, %v535_v31 }
 0x121   :  { %545 = vrot.lane.b32.xlu1 %v540_v32, %s779_s8  ;;  %v542_v42 = vsub.f32 %v904_v29, %v540_v32 }
 0x123   :  { %v543_v43 = vmul.f32 %v542_v42, %v541_v41 }
 0x125   :  { %550 = vrot.lane.b32.xlu1 %v540_v32, %s780_s26  ;;  %v555_v7 = vmul.f32 %v543_v43, %v543_v43 }
 0x127   :  { %v556_v44 = vsel %vm89_vm1, %v555_v7, 0.0 }
 0x134   :  { %294 = vadd.xlane.f32.xlu0 %v293_v38 }
 0x138   :  { %329 = vadd.xlane.f32.xlu0 %v328_v39 }
 0x149   :  { %557 = vadd.xlane.f32.xlu1 %v556_v44 }
 0x183   :  { %v283_v45 = vpop.permute.xlu0 %282 }
 0x184   :  { %v285_v46 = vsub.f32 %v879_v14, %v283_v45 }
 0x186   :  { %v286_v47 = vmul.f32 %v285_v46, %v278_v34 }
 0x187   :  { %v288_v48 = vpop.permute.xlu0 %287 }
 0x188   :  { %v290_v49 = vsub.f32 %v879_v14, %v288_v48  ;;  %v304_v50 = vmul.f32 %v286_v47, %v286_v47 }
 0x18a   :  { %v291_v51 = vmul.f32 %v290_v49, %v278_v34  ;;  %v305_v52 = vsel %vm89_vm1, %v304_v50, 0.0 }
 0x18b   :  { %306 = vadd.xlane.f32.xlu1 %v305_v52 }
 0x18c   :  { %v316_v24 = vmul.f32 %v291_v51, %v291_v51 }
 0x18e   :  { %v317_v53 = vsel %vm89_vm1, %v316_v24, 0.0 }
 0x18f   :  { %318 = vadd.xlane.f32.xlu0 %v317_v53 }
 0x193   :  { %v546_v54 = vpop.permute.xlu1 %545 }
 0x194   :  { %v548_v55 = vsub.f32 %v904_v29, %v546_v54 }
 0x196   :  { %v549_v56 = vmul.f32 %v548_v55, %v541_v41 }
 0x197   :  { %v551_v57 = vpop.permute.xlu1 %550 }
 0x198   :  { %v553_v58 = vsub.f32 %v904_v29, %v551_v57  ;;  %v567_v59 = vmul.f32 %v549_v56, %v549_v56 }
 0x19a   :  { %v554_v60 = vmul.f32 %v553_v58, %v541_v41  ;;  %v568_v14 = vsel %vm89_vm1, %v567_v59, 0.0 }
 0x19b   :  { %569 = vadd.xlane.f32.xlu0 %v568_v14 }
 0x19c   :  { %v579_v62 = vmul.f32 %v554_v60, %v554_v60 }
 0x19e   :  { %v580_v63 = vsel %vm89_vm1, %v579_v62, 0.0 }
 0x19f   :  { %592 = vadd.xlane.f32.xlu0 %v591_v61  ;;  %581 = vadd.xlane.f32.xlu1 %v580_v63 }
 0x1c1   :  { %v295_v0 = vpop.xlane.xlu0 %294 }
 0x1c2   :  { %v296_v1 = vrot.slane %v295_v0, 4 }
 0x1c4   :  { %v297_v2 = vadd.f32 %v296_v1, %v295_v0 }
 0x1c5   :  { %v330_v8 = vpop.xlane.xlu0 %329 }
 0x1c6   :  { %v298_v3 = vrot.slane %v297_v2, 2  ;;  %v331_v9 = vrot.slane %v330_v8, 4 }
 0x1c8   :  { %v299_v4 = vadd.f32 %v298_v3, %v297_v2  ;;  %v332_v11 = vadd.f32 %v331_v9, %v330_v8 }
 0x1ca   :  { %v300_v5 = vrot.slane %v299_v4, 1  ;;  %v333_v17 = vrot.slane %v332_v11, 2 }
 0x1cc   :  { %v301_v6 = vadd.f32 %v300_v5, %v299_v4  ;;  %v334_v25 = vadd.f32 %v333_v17, %v332_v11 }
 0x1ce   :  { %708 = vpush %v301_v6  ;;  %v335_v32 = vrot.slane %v334_v25, 1 }
 0x1d0   :  { %v336_v37 = vadd.f32 %v335_v32, %v334_v25 }
 0x1d6   :  { %v558_v29 = vpop.xlane.xlu1 %557 }
 0x1d7   :  { %v559_v10 = vrot.slane %v558_v29, 4 }
 0x1d9   :  { %v560_v13 = vadd.f32 %v559_v10, %v558_v29 }
 0x1db   :  { %v561_v19 = vrot.slane %v560_v13, 2 }
 0x1dd   :  { %v562_v28 = vadd.f32 %v561_v19, %v560_v13 }
 0x1df   :  { %v563_v34 = vrot.slane %v562_v28, 1 }
 0x1e1   :  { %v564_v39 = vadd.f32 %v563_v34, %v562_v28 }
 0x1ff   :  { %s709_s4 = spop %708 }
 0x218   :  { %v307_v12 = vpop.xlane.xlu1 %306 }
 0x219   :  { %v308_v15 = vrot.slane %v307_v12, 4 }
 0x21b   :  { %v309_v16 = vadd.f32 %v308_v15, %v307_v12 }
 0x21c   :  { %v319_v18 = vpop.xlane.xlu0 %318 }
 0x21d   :  { %v310_v20 = vrot.slane %v309_v16, 2  ;;  %v320_v21 = vrot.slane %v319_v18, 4 }
 0x21f   :  { %v321_v22 = vadd.f32 %v320_v21, %v319_v18  ;;  %v311_v23 = vadd.f32 %v310_v20, %v309_v16 }
 0x221   :  { %v322_v26 = vrot.slane %v321_v22, 2  ;;  %v312_v27 = vrot.slane %v311_v23, 1 }
 0x223   :  { %v313_v30 = vadd.f32 %v312_v27, %v311_v23  ;;  %v323_v31 = vadd.f32 %v322_v26, %v321_v22 }
 0x225   :  { %710 = vpush %v313_v30  ;;  %v324_v33 = vrot.slane %v323_v31, 1 }
 0x227   :  { %v325_v35 = vadd.f32 %v324_v33, %v323_v31 }
 0x228   :  { %v570_v36 = vpop.xlane.xlu0 %569 }
 0x229   :  { %v571_v38 = vrot.slane %v570_v36, 4  ;;  %712 = vpush %v325_v35 }
 0x22a   :  { %714 = vpush %v336_v37 }
 0x22b   :  { %v572_v40 = vadd.f32 %v571_v38, %v570_v36  ;;  %716 = vpush %v564_v39 }
 0x22c   :  { %v593_v41 = vpop.xlane.xlu0 %592  ;;  %v582_v42 = vpop.xlane.xlu1 %581 }
 0x22d   :  { %v573_v43 = vrot.slane %v572_v40, 2  ;;  %v594_v7 = vrot.slane %v593_v41, 4  ;;  %v583_v44 = vrot.slane %v582_v42, 4 }
 0x22f   :  { %v595_v45 = vadd.f32 %v594_v7, %v593_v41  ;;  %v584_v46 = vadd.f32 %v583_v44, %v582_v42  ;;  %v574_v47 = vadd.f32 %v573_v43, %v572_v40 }
 0x231   :  { %v596_v48 = vrot.slane %v595_v45, 2  ;;  %v585_v49 = vrot.slane %v584_v46, 2  ;;  %v575_v50 = vrot.slane %v574_v47, 1 }
 0x233   :  { %v597_v51 = vadd.f32 %v596_v48, %v595_v45  ;;  %v586_v52 = vadd.f32 %v585_v49, %v584_v46  ;;  %v576_v24 = vadd.f32 %v575_v50, %v574_v47 }
 0x235   :  { %718 = vpush %v576_v24  ;;  %v587_v53 = vrot.slane %v586_v52, 1  ;;  %v598_v54 = vrot.slane %v597_v51, 1 }
 0x237   :  { %v588_v55 = vadd.f32 %v587_v53, %v586_v52  ;;  %v599_v56 = vadd.f32 %v598_v54, %v597_v51 }
 0x239   :  { %720 = vpush %v588_v55 }
 0x23a   :  { %722 = vpush %v599_v56 }
 0x256   :  { %s711_s30 = spop %710 }
 0x25a   :  { %s713_s10 = spop %712 }
 0x25b   :  { %s715_s11 = spop %714 }
 0x25c   :  { %s717_s12 = spop %716 }
 0x25d   :  { %s566_s18 = sadd.f32 %s717_s12, %s709_s4 }
 0x266   :  { %s719_s13 = spop %718 }
 0x267   :  { %s578_s1 = sadd.f32 %s719_s13, %s711_s30 }
 0x269   :  { %s604_s19 = sadd.f32 %s578_s1, %s566_s18 }
 0x26a   :  { %s721_s14 = spop %720 }
 0x26b   :  { %s590_s15 = sadd.f32 %s721_s14, %s713_s10  ;;  %s723_s16 = spop %722 }
 0x26c   :  { %s601_s17 = sadd.f32 %s723_s16, %s715_s11  ;;  %s605_s20 = smul.f32 0.5, %s604_s19 }
 0x26e   :  { %p602_p10 = scmp.gt.f32.partialorder %s601_s17, 0.0  ;;  %s606_s21 = sadd.f32 %s605_s20, %s590_s15 }
 0x270   :  { %s985_s17 = smov (!%p602_p10, %s601_s17), 1.0 }
 0x271   :  { %s607_s0 = smul.f32 2.0, %s985_s17 }
 0x273   :  { %v608_v57 = vstv %s607_s0 }
 0x274   :  { %733 = vrcp.f32 %v608_v57 }
 0x27e   :  { %v734_v58 = vpop.eup %733 }
 0x27f   :  { %724 = vpush %v734_v58 }
 0x2b0   :  { %s725_s22 = spop %724 }
 0x2b1   :  { %s611_s23 = smul.f32 %s725_s22, %s606_s21 }
 0x2b3   :  { %613 = sst [smem:[#allocation7]] %s611_s23 }
 0x2b4   :  { %768 = shalt.err (!%p765_p13)
}
 0x2b5   :  { %s781_s26 = smov [#allocation7]  }
 0x2b6   :  { %621 = dma.smem_to_hbm %s781_s26, 16, %s983_s9, [#allocation3]  }
 0x2b7   :  { %773 = dma.done.wait [#allocation3], 16  }
 0x2b8   :  { %774 = vsyncadd [#allocation3], 4294967280 }
 0x2b9   :  { %625 = sfence }
 0x2ba   :  { %626 = vsyncpa [#allocation3], 1 }
 0x2bb   :  { %627 = vsyncpa [#allocation4], 1 }
 0x2bc   :  { %628 = vsyncpa [#allocation6], 1 }

</bundles_post_ra>
